<compile_context>
chip_gen: v5e
topology: v5e:2x2
jax: 0.10.0
libtpu: 0.0.40
codegen_flags: <defaults>
</compile_context>

<pallas_src>
import jax
import jax.numpy as jnp
from jax.experimental import pallas as pl
from jax.experimental.pallas import tpu as pltpu

LANES = 128


def mlp_kernel(params_ref, x_ref, o_ref):
    # params_ref: SMEM f32[9] = [w00, w01, w10, w11, b0, b1, v0, v1, c]
    # x_ref:      VMEM (2, TR, 128) -- two dense feature planes, batch on (rows, lanes)
    # o_ref:      VMEM (TR, 128)    -- dense output plane
    x0 = x_ref[0]  # (TR, 128), fully sublane/lane dense
    x1 = x_ref[1]  # (TR, 128)

    w00 = params_ref[0]
    w01 = params_ref[1]
    w10 = params_ref[2]
    w11 = params_ref[3]
    b0 = params_ref[4]
    b1 = params_ref[5]
    v0 = params_ref[6]
    v1 = params_ref[7]
    c = params_ref[8]

    # Hidden layer: h_j = tanh(W1[j,0]*x0 + W1[j,1]*x1 + b1[j])  (VPU + EUP, no MXU)
    h0 = jnp.tanh(w00 * x0 + w01 * x1 + b0)
    h1 = jnp.tanh(w10 * x0 + w11 * x1 + b1)

    # Output layer: y = W2[0,0]*h0 + W2[0,1]*h1 + b2  -> dense (TR, 128) store
    o_ref[...] = (v0 * h0 + v1 * h1 + c).astype(o_ref.dtype)


def neural_network_forward(x, w1, b1, w2, b2, *, tr=1024):
    """Forward pass of tanh(x @ w1.T + b1) @ w2.T + b2, returns (B, 1).

    x:  (B, 2)   w1: (2, 2)   b1: (2,)   w2: (1, 2)   b2: (1,)
    tr: rows (of 128 lanes each) per grid step; multiple of 8.
        tr=1024 -> 128K batch elements / ~1.5 MiB of tile traffic per step.
    """
    B = x.shape[0]
    dtype = x.dtype

    # Lay the batch out as (rows, 128 lanes); pad rows up to a multiple of 8.
    rows_needed = pl.cdiv(B, LANES)
    rows_aligned = max(8, ((rows_needed + 7) // 8) * 8)

    # Clamp the tile so tiny batches don't pad to a huge tile; keep multiple of 8.
    tr_eff = max(8, (min(tr, rows_aligned) // 8) * 8)
    grid_r = pl.cdiv(rows_aligned, tr_eff)
    r_pad = grid_r * tr_eff
    b_pad = r_pad * LANES

    # Build the two feature planes: (2, r_pad, 128); padding columns are zeros
    # (they flow through tanh harmlessly and are sliced off afterwards).
    x_t = jnp.zeros((2, b_pad), dtype).at[:, :B].set(x.T)
    x_planes = x_t.reshape(2, r_pad, LANES)

    # Pack all parameters into one flat SMEM scalar vector.
    params = jnp.concatenate([
        w1.reshape(-1).astype(jnp.float32),   # w00, w01, w10, w11
        b1.reshape(-1).astype(jnp.float32),   # b0, b1
        w2.reshape(-1).astype(jnp.float32),   # v0, v1
        b2.reshape(-1).astype(jnp.float32),   # c
    ])  # (9,)

    cost = pl.CostEstimate(
        flops=14 * b_pad,
        transcendentals=2 * b_pad,
        bytes_accessed=12 * b_pad,
    )

    out = pl.pallas_call(
        mlp_kernel,
        out_shape=jax.ShapeDtypeStruct((r_pad, LANES), dtype),
        grid=(grid_r,),
        in_specs=[
            pl.BlockSpec(memory_space=pltpu.MemorySpace.SMEM),      # params (whole, SMEM)
            pl.BlockSpec((2, tr_eff, LANES), lambda i: (0, i, 0)),  # both feature planes
        ],
        out_specs=pl.BlockSpec((tr_eff, LANES), lambda i: (i, 0)),
        compiler_params=pltpu.CompilerParams(
            # Batch tiles are independent; safe on 1-TC chips, shardable on v7x.
            dimension_semantics=("parallel",),
            # Explicit cap keeps the double-buffered footprint (~3 MiB at tr=1024)
            # well inside v7x's 64 MiB physical / 32 MiB scoped VMEM as well as
            # v5e's 16 MiB default scoped VMEM.
            vmem_limit_bytes=32 * 1024 * 1024,
        ),
        cost_estimate=cost,
    )(params, x_planes)

    # Undo the (rows, lanes) layout: flatten and take the first B batch entries.
    return out.reshape(b_pad)[:B].reshape(B, 1)


if __name__ == "__main__":
    key = jax.random.PRNGKey(0)
    k_w1, k_b1, k_w2, k_b2 = jax.random.split(key, 4)

    # nn.Linear-shaped parameters:
    #   linear:  weight (2, 2), bias (2,)
    #   linear2: weight (1, 2), bias (1,)
    w1 = jax.random.uniform(k_w1, (2, 2), jnp.float32, -0.5, 0.5)
    b1 = jax.random.uniform(k_b1, (2,), jnp.float32, -0.5, 0.5)
    w2 = jax.random.uniform(k_w2, (1, 2), jnp.float32, -0.5, 0.5)
    b2 = jax.random.uniform(k_b2, (1,), jnp.float32, -0.5, 0.5)

    # XOR truth-table inputs: batch=4, in_features=2
    x = jnp.array([[0.0, 0.0],
                   [0.0, 1.0],
                   [1.0, 0.0],
                   [1.0, 1.0]], dtype=jnp.float32)

    out = neural_network_forward(x, w1, b1, w2, b2)
    out = jax.block_until_ready(out)

    # Pure-JAX reference check
    ref = jnp.tanh(x @ w1.T + b1) @ w2.T + b2
    assert out.shape == (4, 1)
    assert jnp.allclose(out, ref, atol=1e-5, rtol=1e-5)

    print("KERNEL_OK")
</pallas_src>

<mosaic_0001>
module attributes {stable_mosaic.version = 11 : i64} {
  func.func @mlp_kernel(%arg0: i32, %arg1: memref<9xf32, #tpu.memory_space<smem>>, %arg2: memref<2x8x128xf32, #tpu.memory_space<vmem>>, %arg3: memref<8x128xf32, #tpu.memory_space<vmem>>) attributes {dimension_semantics = [#tpu.dimension_semantics<parallel>], iteration_bounds = array<i64: 1>, scalar_prefetch = 0 : i64, scratch_operands = 0 : i64, tpu.core_type = #tpu.core_type<tc>, window_params = [{transform_indices = @transform_0, window_bounds = array<i64: 9>}, {transform_indices = @transform_1, window_bounds = array<i64: 2, 8, 128>}, {transform_indices = @transform_2, window_bounds = array<i64: 8, 128>}]} {
    %c0 = arith.constant 0 : index
    %c0_0 = arith.constant 0 : index
    %c0_1 = arith.constant 0 : index
    %0 = vector.load %arg2[%c0, %c0_0, %c0_1] : memref<2x8x128xf32, #tpu.memory_space<vmem>>, vector<1x8x128xf32>
    %1 = vector.shape_cast %0 : vector<1x8x128xf32> to vector<8x128xf32>
    %c1 = arith.constant 1 : index
    %c0_2 = arith.constant 0 : index
    %c0_3 = arith.constant 0 : index
    %2 = vector.load %arg2[%c1, %c0_2, %c0_3] : memref<2x8x128xf32, #tpu.memory_space<vmem>>, vector<1x8x128xf32>
    %3 = vector.shape_cast %2 : vector<1x8x128xf32> to vector<8x128xf32>
    %c0_4 = arith.constant 0 : index
    %4 = memref.load %arg1[%c0_4] : memref<9xf32, #tpu.memory_space<smem>>
    %c1_5 = arith.constant 1 : index
    %5 = memref.load %arg1[%c1_5] : memref<9xf32, #tpu.memory_space<smem>>
    %c2 = arith.constant 2 : index
    %6 = memref.load %arg1[%c2] : memref<9xf32, #tpu.memory_space<smem>>
    %c3 = arith.constant 3 : index
    %7 = memref.load %arg1[%c3] : memref<9xf32, #tpu.memory_space<smem>>
    %c4 = arith.constant 4 : index
    %8 = memref.load %arg1[%c4] : memref<9xf32, #tpu.memory_space<smem>>
    %c5 = arith.constant 5 : index
    %9 = memref.load %arg1[%c5] : memref<9xf32, #tpu.memory_space<smem>>
    %c6 = arith.constant 6 : index
    %10 = memref.load %arg1[%c6] : memref<9xf32, #tpu.memory_space<smem>>
    %c7 = arith.constant 7 : index
    %11 = memref.load %arg1[%c7] : memref<9xf32, #tpu.memory_space<smem>>
    %c8 = arith.constant 8 : index
    %12 = memref.load %arg1[%c8] : memref<9xf32, #tpu.memory_space<smem>>
    %13 = vector.broadcast %4 : f32 to vector<8x128xf32>
    %14 = arith.mulf %13, %1 : vector<8x128xf32>
    %15 = vector.broadcast %5 : f32 to vector<8x128xf32>
    %16 = arith.mulf %15, %3 : vector<8x128xf32>
    %17 = arith.addf %14, %16 : vector<8x128xf32>
    %18 = vector.broadcast %8 : f32 to vector<8x128xf32>
    %19 = arith.addf %17, %18 : vector<8x128xf32>
    %20 = math.tanh %19 : vector<8x128xf32>
    %21 = vector.broadcast %6 : f32 to vector<8x128xf32>
    %22 = arith.mulf %21, %1 : vector<8x128xf32>
    %23 = vector.broadcast %7 : f32 to vector<8x128xf32>
    %24 = arith.mulf %23, %3 : vector<8x128xf32>
    %25 = arith.addf %22, %24 : vector<8x128xf32>
    %26 = vector.broadcast %9 : f32 to vector<8x128xf32>
    %27 = arith.addf %25, %26 : vector<8x128xf32>
    %28 = math.tanh %27 : vector<8x128xf32>
    %29 = vector.broadcast %10 : f32 to vector<8x128xf32>
    %30 = arith.mulf %29, %20 : vector<8x128xf32>
    %31 = vector.broadcast %11 : f32 to vector<8x128xf32>
    %32 = arith.mulf %31, %28 : vector<8x128xf32>
    %33 = arith.addf %30, %32 : vector<8x128xf32>
    %34 = vector.broadcast %12 : f32 to vector<8x128xf32>
    %35 = arith.addf %33, %34 : vector<8x128xf32>
    %c0_6 = arith.constant 0 : index
    %c0_7 = arith.constant 0 : index
    %36 = vector.load %arg3[%c0_6, %c0_7] : memref<8x128xf32, #tpu.memory_space<vmem>>, vector<8x128xf32>
    tpu.vector_store %arg3[%c0_6, %c0_7], %35 {strides = array<i32>} : memref<8x128xf32, #tpu.memory_space<vmem>>, vector<8x128xf32>,
    return
  }
  func.func @transform_0(%arg0: i32) -> i32 {
    %c0_i32 = arith.constant 0 : i32
    %c0_i32_0 = arith.constant 0 : i32
    return %c0_i32 : i32
  }
  func.func @transform_1(%arg0: i32) -> (i32, i32, i32) {
    %c0_i32 = arith.constant 0 : i32
    %c0_i32_0 = arith.constant 0 : i32
    %c0_i32_1 = arith.constant 0 : i32
    return %c0_i32, %arg0, %c0_i32_0 : i32, i32, i32
  }
  func.func @transform_2(%arg0: i32) -> (i32, i32) {
    %c0_i32 = arith.constant 0 : i32
    %c0_i32_0 = arith.constant 0 : i32
    return %arg0, %c0_i32 : i32, i32
  }
}

</mosaic_0001>

<bundles_post_ra>
// kernel: tpu_custom_call.1
= control target key start
LH: loop header
LB: loop body
LE: loop exit
PB: predicated region body
PF: predicated region fallthrough
CT: control target
= control target key end

     0   :  { %7 = vsyncpa [#allocation5], 0  ;;  %s207_s0 = inlined_call_operand.hbm [shape: f32[9], index: 0, kind: input, shape index: {}]   ;;  %s208_s1 = inlined_call_operand.hbm [shape: f32[2,8,128], index: 1, kind: input, shape index: {}]   ;;  %s209_s2 = inlined_call_operand.hbm [shape: f32[8,128], index: 2, kind: output, shape index: {}]  }
   0x1   :  { %8 = vsyncpa [#allocation3], 0 }
   0x2   :  { %9 = vsyncpa [#allocation4], 0  ;;  %s15_s11 = sshll.u32 %s207_s0, 4  ;;  %s23_s14 = sshll.u32 %s208_s1, 4  ;;  %s16_s11 = int_to_ptr.hbm [resolvable:$true] %s15_s11  ;;  %s24_s14 = int_to_ptr.hbm [resolvable:$true] %s23_s14 }
   0x3   :  { %s178_s15 = smov [#allocation2]   ;;  %s179_s16 = smov [#allocation6]  }
   0x4   :  { %18 = dma.hbm_to_smem %s16_s11, 16, %s178_s15, [#allocation5]  }
   0x5   :  { %s25_s17 = sshll.u32 %s179_s16, 4  ;;  %s180_s18 = smov 128   ;;  %s26_s17 = int_to_ptr.vmem [resolvable:$true] %s25_s17 }
   0x6   :  { %s181_s19 = smov 8  }
   0x7   :  { %31 = dma.hbm_to_vmem [thread:$0]  %s24_s14, 256, %s26_s17, [#allocation3], %s180_s18, %s180_s18, %s181_s19  }
   0x8   :  { %172 = dma.done.wait [#allocation5], 16  }
   0x9   :  { %173 = vsyncadd [#allocation5], 4294967280 }
   0xa   :  { %174 = dma.done.wait [#allocation3], 256  }
   0xb   :  { %175 = vsyncadd [#allocation3], 4294967040 }
   0xc   :  { %40 = sfence }
   0xd   :  { %s44_s0 = sld [smem:[#allocation2]]  ;;  %v41_v0 = vld [vmem:[#allocation6] sm:$0xff]  ;;  %v43_v1 = vld [vmem:[#allocation6 + $0x8] sm:$0xff]  ;;  %s182_s27 = smov [#allocation7]  }
   0xe   :  { %s95_s20 = sld [smem:[#allocation2 + $0x1]]  ;;  %s82_s28 = sshll.u32 %s182_s27, 4  ;;  %s83_s28 = int_to_ptr.vmem [resolvable:$true] %s82_s28 }
   0xf   :  { %s96_s21 = sld [smem:[#allocation2 + $0x2]]  ;;  %s84_s3 = sshll.u32 %s209_s2, 4  ;;  %s85_s3 = int_to_ptr.hbm [resolvable:$true] %s84_s3 }
  0x10   :  { %s97_s22 = sld [smem:[#allocation2 + $0x3]] }
  0x11   :  { %s98_s1 = sld [smem:[#allocation2 + $0x4]] }
  0x12   :  { %s99_s23 = sld [smem:[#allocation2 + $0x5]] }
  0x13   :  { %v53_v2 = vstv %s44_s0  ;;  %s100_s24 = sld [smem:[#allocation2 + $0x6]] }
  0x14   :  { %v54_v3 = vmul.f32 %v53_v2, %v41_v0  ;;  %v55_v4 = vstv %s95_s20  ;;  %s101_s25 = sld [smem:[#allocation2 + $0x7]] }
  0x15   :  { %v56_v5 = vmul.f32 %v55_v4, %v43_v1  ;;  %v61_v6 = vstv %s96_s21  ;;  %s102_s26 = sld [smem:[#allocation2 + $0x8]] }
  0x16   :  { %v62_v7 = vmul.f32 %v61_v6, %v41_v0  ;;  %v63_v8 = vstv %s97_s22 }
  0x17   :  { %v57_v9 = vadd.f32 %v56_v5, %v54_v3  ;;  %v58_v10 = vstv %s98_s1  ;;  %v64_v11 = vmul.f32 %v63_v8, %v43_v1 }
  0x18   :  { %v66_v12 = vstv %s99_s23 }
  0x19   :  { %v59_v13 = vadd.f32 %v58_v10, %v57_v9  ;;  %v65_v14 = vadd.f32 %v64_v11, %v62_v7  ;;  %v69_v16 = vstv %s100_s24 }
  0x1a   :  { %v71_v18 = vstv %s101_s25 }
  0x1b   :  { %108 = vtanh.f32 %v59_v13  ;;  %v67_v15 = vadd.f32 %v66_v12, %v65_v14  ;;  %v74_v22 = vstv %s102_s26 }
  0x1d   :  { %110 = vtanh.f32 %v67_v15 }
  0x21   :  { %v109_v17 = vpop.eup %108 }
  0x22   :  { %v70_v19 = vmul.f32 %v109_v17, %v69_v16 }
  0x23   :  { %v111_v20 = vpop.eup %110 }
  0x24   :  { %v72_v21 = vmul.f32 %v111_v20, %v71_v18 }
  0x26   :  { %v73_v23 = vadd.f32 %v72_v21, %v70_v19 }
  0x28   :  { %v75_v24 = vadd.f32 %v74_v22, %v73_v23 }
  0x2a   :  { %76 = vst [vmem:[#allocation7] sm:$0xff] %v75_v24 }
  0x2b   :  { %87 = dma.vmem_to_hbm [thread:$0]  %s83_s28, 128, %s85_s3, [#allocation4]  }
  0x2c   :  { %176 = dma.done.wait [#allocation4], 128  }
  0x2d   :  { %177 = vsyncadd [#allocation4], 4294967168 }
  0x2e   :  { %92 = vsyncpa [#allocation3], 1 }
  0x2f   :  { %93 = vsyncpa [#allocation4], 1 }
  0x30   :  { %94 = vsyncpa [#allocation5], 1 }

</bundles_post_ra>
